<compile_context>
chip_gen: v7x
topology: tpu7x:2x2x1
jax: 0.10.0
libtpu: 0.0.40
codegen_flags: <defaults>
</compile_context>

<pallas_src>
import jax
import jax.numpy as jnp
from jax.experimental import pallas as pl
from jax.experimental.pallas import tpu as pltpu

# ----------------------------- configuration --------------------------------
INPUT_SIZE = 16
HIDDEN_SIZE = 32
OUTPUT_SIZE = 8
N_LAYERS = 2
BATCH = 1          # forward() only supports batch==1 (input.view(1, -1))
SEQ_LEN = 8        # number of forward() steps fused into one kernel call
MODEL = "rnn"      # torch.nn.RNN(..., nonlinearity='relu')


# ------------------------------- kernel -------------------------------------
def rnn_seq_kernel(xs_ref, h0_ref, w_in0_ref, w_in_hi_ref, w_hh_ref,
                   b_lay_ref, w_h2o_ref, b_h2o_ref, probs_ref, hT_ref):
    """Runs T ReLU-RNN steps with all parameters VMEM/vreg resident.

    xs_ref     : (T, I)        raw input rows (no lane padding needed)
    h0_ref     : (L, H)        initial hidden state, one sublane row per layer
    w_in0_ref  : (I, H)        layer-0 input weight with the i2h Linear folded in
    w_in_hi_ref: (max(L-1,1), H, H)  input-path weights for layers 1..L-1
    w_hh_ref   : (L, H, H)     recurrent weights (pre-transposed)
    b_lay_ref  : (L, H)        per-layer fused biases (b_ih + b_hh [+ folded i2h])
    w_h2o_ref  : (H, O)        h2o weight, pre-transposed
    b_h2o_ref  : (1, O)        h2o bias
    probs_ref  : (T, O)        per-step softmax output (module's `out1`)
    hT_ref     : (L, H)        final hidden state
    """
    T = xs_ref.shape[0]
    L = w_hh_ref.shape[0]
    H = w_hh_ref.shape[2]

    # ---- hoisted out of the time loop: per-layer weight/bias slices ----
    w_hh = [w_hh_ref[l] for l in range(L)]              # L x (H, H)
    w_in_hi = [w_in_hi_ref[l] for l in range(L - 1)]    # (L-1) x (H, H)
    b_lay = [b_lay_ref[l:l + 1, :] for l in range(L)]   # L x (1, H), row reads

    # ---- layer-0 input path, batched over all T steps (off the serial chain)
    pre_x0 = jnp.dot(xs_ref[...], w_in0_ref[...],
                     preferred_element_type=jnp.float32) + b_lay[0]   # (T, H)

    h0 = h0_ref[...]                                    # (L, H)
    h = [h0[l:l + 1, :] for l in range(L)]              # L x (1, H)

    # ---- recurrent chain: only the truly sequential work stays in here ----
    tops = []
    for t in range(T):
        # layer 0: input contribution was precomputed; one recurrent dot.
        h[0] = jnp.maximum(
            pre_x0[t:t + 1, :]
            + jnp.dot(h[0], w_hh[0], preferred_element_type=jnp.float32),
            0.0)
        inp = h[0]
        for l in range(1, L):
            pre = (jnp.dot(inp, w_in_hi[l - 1],
                           preferred_element_type=jnp.float32)
                   + jnp.dot(h[l], w_hh[l],
                             preferred_element_type=jnp.float32)
                   + b_lay[l])
            h[l] = jnp.maximum(pre, 0.0)                # relu
            inp = h[l]
        tops.append(inp)

    # ---- h2o + softmax batched across the whole sequence, single store ----
    top = jnp.concatenate(tops, axis=0)                 # (T, H)
    logits = jnp.dot(top, w_h2o_ref[...],
                     preferred_element_type=jnp.float32) + b_h2o_ref[...]
    m = jnp.max(logits, axis=-1, keepdims=True)
    e = jnp.exp(logits - m)
    probs_ref[...] = e / jnp.sum(e, axis=-1, keepdims=True)   # exact division

    hT_ref[...] = jnp.concatenate(h, axis=0)            # (L, H), one store


# -------------------------- one-time param prep -------------------------------
def prepare_params(params):
    """Hoisted out of the per-step path: transpose, fold i2h into layer 0,
    pre-add biases, stack per-layer tensors. Call ONCE per parameter set."""
    I, H, O, L = INPUT_SIZE, HIDDEN_SIZE, OUTPUT_SIZE, N_LAYERS

    w_i2h_t = params["w_i2h"].T                         # (I, H)
    w_ih_t = jnp.transpose(params["w_ih"], (0, 2, 1))   # (L, H, H)
    w_hh_t = jnp.transpose(params["w_hh"], (0, 2, 1))   # (L, H, H)

    # Fold i2h into the layer-0 RNN step (no nonlinearity in between -> exact
    # up to fp reassociation):
    #   pre0 = x @ (W_i2h^T @ W_ih0^T) + (b_i2h @ W_ih0^T + b_ih0 + b_hh0)
    #          + h0 @ W_hh0^T
    w_in0 = w_i2h_t @ w_ih_t[0]                         # (I, H)
    b0 = (params["b_i2h"].reshape(1, H) @ w_ih_t[0]
          + params["b_ih"][0].reshape(1, H)
          + params["b_hh"][0].reshape(1, H))            # (1, H)

    b_list = [b0]
    for l in range(1, L):
        b_list.append((params["b_ih"][l] + params["b_hh"][l]).reshape(1, H))
    b_lay = jnp.concatenate(b_list, axis=0)             # (L, H) sublane-stacked

    if L > 1:
        w_in_hi = w_ih_t[1:]                            # (L-1, H, H)
    else:
        w_in_hi = jnp.zeros((1, H, H), jnp.float32)     # unused dummy slab

    return {
        "w_in0": w_in0.astype(jnp.float32),             # (I, H)
        "w_in_hi": w_in_hi.astype(jnp.float32),         # (max(L-1,1), H, H)
        "w_hh": w_hh_t.astype(jnp.float32),             # (L, H, H)
        "b_lay": b_lay.astype(jnp.float32),             # (L, H)
        "w_h2o": params["w_h2o"].T.astype(jnp.float32), # (H, O)
        "b_h2o": params["b_h2o"].reshape(1, O).astype(jnp.float32),  # (1, O)
    }


# ------------------------------- wrappers ------------------------------------
def rnn_module_forward_seq(xs, hidden0, prep):
    """Equivalent to calling RNNModule.forward() once per timestep.

    xs: (T, 1, I) float32, hidden0: (L, 1, H) float32.
    Returns (probs (T, O), new_hidden (L, 1, H))."""
    I, H, O, L = INPUT_SIZE, HIDDEN_SIZE, OUTPUT_SIZE, N_LAYERS
    T = xs.shape[0]

    xs2 = xs.reshape(T, I)               # no lane padding needed anymore
    h0 = hidden0.reshape(L, H)           # one sublane row per layer

    vmem = pl.BlockSpec(memory_space=pltpu.MemorySpace.VMEM)
    probs, hT = pl.pallas_call(
        rnn_seq_kernel,
        out_shape=(jax.ShapeDtypeStruct((T, O), jnp.float32),
                   jax.ShapeDtypeStruct((L, H), jnp.float32)),
        in_specs=[vmem] * 8,
        out_specs=(vmem, vmem),
    )(xs2, h0, prep["w_in0"], prep["w_in_hi"], prep["w_hh"],
      prep["b_lay"], prep["w_h2o"], prep["b_h2o"])
    return probs, hT.reshape(L, 1, H)


def rnn_module_forward(x, hidden, prep):
    """Exact original forward() signature: single step, batch==1."""
    probs, h_new = rnn_module_forward_seq(x.reshape(1, 1, -1), hidden, prep)
    return probs, h_new     # probs: (1, O)


# --------------------------- pure-JAX reference -------------------------------
def rnn_module_forward_ref(xs, hidden, params):
    """Unfused PyTorch-faithful math, stepped T times."""
    outs = []
    h = hidden
    for t in range(xs.shape[0]):
        x = xs[t]                                            # (1, I)
        enc = x @ params["w_i2h"].T + params["b_i2h"]        # i2h
        inp = enc
        h_new = []
        for l in range(N_LAYERS):
            pre = (inp @ params["w_ih"][l].T + params["b_ih"][l]
                   + h[l] @ params["w_hh"][l].T + params["b_hh"][l])
            hl = jnp.maximum(pre, 0.0)
            h_new.append(hl)
            inp = hl
        h = jnp.stack(h_new, axis=0)
        logits = inp @ params["w_h2o"].T + params["b_h2o"]
        outs.append(jax.nn.softmax(logits, axis=-1))
    return jnp.concatenate(outs, axis=0), h


# --------------------------------- main ---------------------------------------
if __name__ == "__main__":
    key = jax.random.PRNGKey(0)
    keys = jax.random.split(key, 10)

    I, H, O, L, T = INPUT_SIZE, HIDDEN_SIZE, OUTPUT_SIZE, N_LAYERS, SEQ_LEN

    def uniform(k, shape, fan_in):
        bound = 1.0 / jnp.sqrt(jnp.float32(fan_in))
        return jax.random.uniform(k, shape, jnp.float32, -bound, bound)

    # Deterministic synthetic parameters (PyTorch-style shapes / init scale).
    params = {
        "w_i2h": uniform(keys[0], (H, I), I),
        "b_i2h": uniform(keys[1], (H,), I),
        "w_ih": uniform(keys[2], (L, H, H), H),
        "w_hh": uniform(keys[3], (L, H, H), H),
        "b_ih": uniform(keys[4], (L, H), H),
        "b_hh": uniform(keys[5], (L, H), H),
        "w_h2o": uniform(keys[6], (O, H), H),
        "b_h2o": uniform(keys[7], (O,), H),
    }

    # One-time (hoisted) param prep: transposes + algebraic fusions.
    prep = prepare_params(params)

    xs = jax.random.normal(keys[8], (T, BATCH, I), jnp.float32)   # sequence
    hidden0 = jnp.zeros((L, BATCH, H), jnp.float32)               # init_hidden

    probs, h_new = rnn_module_forward_seq(xs, hidden0, prep)
    probs = jax.block_until_ready(probs)
    h_new = jax.block_until_ready(h_new)

    probs_ref, h_new_ref = rnn_module_forward_ref(xs, hidden0, params)

    assert probs.shape == (T, O) and h_new.shape == (L, BATCH, H)
    assert jnp.allclose(probs, probs_ref, atol=1e-5, rtol=1e-5)
    assert jnp.allclose(h_new, h_new_ref, atol=1e-5, rtol=1e-5)
    assert jnp.allclose(jnp.sum(probs, axis=-1), 1.0, atol=1e-5)

    # Single-step path (original forward() signature) also works.
    p1, h1 = rnn_module_forward(xs[0], hidden0, prep)
    p1 = jax.block_until_ready(p1)
    assert p1.shape == (1, O) and h1.shape == (L, BATCH, H)
    assert jnp.allclose(p1, probs_ref[0:1], atol=1e-5, rtol=1e-5)

    print("KERNEL_OK")
</pallas_src>

<mosaic_0001>
module attributes {stable_mosaic.version = 11 : i64} {
  func.func @rnn_seq_kernel(%arg0: memref<8x16xf32, #tpu.memory_space<vmem>>, %arg1: memref<2x32xf32, #tpu.memory_space<vmem>>, %arg2: memref<16x32xf32, #tpu.memory_space<vmem>>, %arg3: memref<1x32x32xf32, #tpu.memory_space<vmem>>, %arg4: memref<2x32x32xf32, #tpu.memory_space<vmem>>, %arg5: memref<2x32xf32, #tpu.memory_space<vmem>>, %arg6: memref<32x8xf32, #tpu.memory_space<vmem>>, %arg7: memref<1x8xf32, #tpu.memory_space<vmem>>, %arg8: memref<8x8xf32, #tpu.memory_space<vmem>>, %arg9: memref<2x32xf32, #tpu.memory_space<vmem>>) attributes {dimension_semantics = [], scalar_prefetch = 0 : i64, scratch_operands = 0 : i64, tpu.core_type = #tpu.core_type<tc>} {
    %c0 = arith.constant 0 : index
    %c0_0 = arith.constant 0 : index
    %c0_1 = arith.constant 0 : index
    %0 = vector.load %arg4[%c0, %c0_0, %c0_1] : memref<2x32x32xf32, #tpu.memory_space<vmem>>, vector<1x32x32xf32>
    %1 = vector.shape_cast %0 : vector<1x32x32xf32> to vector<32x32xf32>
    %c1 = arith.constant 1 : index
    %c0_2 = arith.constant 0 : index
    %c0_3 = arith.constant 0 : index
    %2 = vector.load %arg4[%c1, %c0_2, %c0_3] : memref<2x32x32xf32, #tpu.memory_space<vmem>>, vector<1x32x32xf32>
    %3 = vector.shape_cast %2 : vector<1x32x32xf32> to vector<32x32xf32>
    %c0_4 = arith.constant 0 : index
    %c0_5 = arith.constant 0 : index
    %c0_6 = arith.constant 0 : index
    %4 = vector.load %arg3[%c0_4, %c0_5, %c0_6] : memref<1x32x32xf32, #tpu.memory_space<vmem>>, vector<1x32x32xf32>
    %5 = vector.shape_cast %4 : vector<1x32x32xf32> to vector<32x32xf32>
    %c0_7 = arith.constant 0 : index
    %c0_8 = arith.constant 0 : index
    %6 = vector.load %arg5[%c0_7, %c0_8] : memref<2x32xf32, #tpu.memory_space<vmem>>, vector<1x32xf32>
    %c1_9 = arith.constant 1 : index
    %c0_10 = arith.constant 0 : index
    %7 = vector.load %arg5[%c1_9, %c0_10] : memref<2x32xf32, #tpu.memory_space<vmem>>, vector<1x32xf32>
    %c0_11 = arith.constant 0 : index
    %c0_12 = arith.constant 0 : index
    %8 = vector.load %arg0[%c0_11, %c0_12] : memref<8x16xf32, #tpu.memory_space<vmem>>, vector<8x16xf32>
    %c0_13 = arith.constant 0 : index
    %c0_14 = arith.constant 0 : index
    %9 = vector.load %arg2[%c0_13, %c0_14] : memref<16x32xf32, #tpu.memory_space<vmem>>, vector<16x32xf32>
    %cst = arith.constant dense<0.000000e+00> : vector<8x32xf32>
    %10 = tpu.matmul %8, %9, %cst {dimension_numbers = #tpu.dot_dimension_numbers<[1], [0], [0], [1], [0, 0, 1, 1], [], []>} : vector<8x16xf32>, vector<16x32xf32>, vector<8x32xf32> -> vector<8x32xf32>
    %11 = vector.broadcast %6 : vector<1x32xf32> to vector<8x32xf32>
    %12 = arith.addf %10, %11 : vector<8x32xf32>
    %c0_15 = arith.constant 0 : index
    %c0_16 = arith.constant 0 : index
    %13 = vector.load %arg1[%c0_15, %c0_16] : memref<2x32xf32, #tpu.memory_space<vmem>>, vector<2x32xf32>
    %14 = vector.extract_strided_slice %13 {offsets = [0, 0], sizes = [1, 32], strides = [1, 1]} : vector<2x32xf32> to vector<1x32xf32>
    %15 = vector.extract_strided_slice %13 {offsets = [1, 0], sizes = [1, 32], strides = [1, 1]} : vector<2x32xf32> to vector<1x32xf32>
    %16 = vector.extract_strided_slice %12 {offsets = [0, 0], sizes = [1, 32], strides = [1, 1]} : vector<8x32xf32> to vector<1x32xf32>
    %cst_17 = arith.constant dense<0.000000e+00> : vector<1x32xf32>
    %17 = tpu.matmul %14, %1, %cst_17 {dimension_numbers = #tpu.dot_dimension_numbers<[1], [0], [0], [1], [0, 0, 1, 1], [], []>} : vector<1x32xf32>, vector<32x32xf32>, vector<1x32xf32> -> vector<1x32xf32>
    %18 = arith.addf %16, %17 : vector<1x32xf32>
    %cst_18 = arith.constant 0.000000e+00 : f32
    %19 = vector.broadcast %cst_18 : f32 to vector<1x32xf32>
    %20 = arith.maximumf %18, %19 : vector<1x32xf32>
    %cst_19 = arith.constant dense<0.000000e+00> : vector<1x32xf32>
    %21 = tpu.matmul %20, %5, %cst_19 {dimension_numbers = #tpu.dot_dimension_numbers<[1], [0], [0], [1], [0, 0, 1, 1], [], []>} : vector<1x32xf32>, vector<32x32xf32>, vector<1x32xf32> -> vector<1x32xf32>
    %cst_20 = arith.constant dense<0.000000e+00> : vector<1x32xf32>
    %22 = tpu.matmul %15, %3, %cst_20 {dimension_numbers = #tpu.dot_dimension_numbers<[1], [0], [0], [1], [0, 0, 1, 1], [], []>} : vector<1x32xf32>, vector<32x32xf32>, vector<1x32xf32> -> vector<1x32xf32>
    %23 = arith.addf %21, %22 : vector<1x32xf32>
    %24 = arith.addf %23, %7 : vector<1x32xf32>
    %cst_21 = arith.constant 0.000000e+00 : f32
    %25 = vector.broadcast %cst_21 : f32 to vector<1x32xf32>
    %26 = arith.maximumf %24, %25 : vector<1x32xf32>
    %27 = vector.extract_strided_slice %12 {offsets = [1, 0], sizes = [1, 32], strides = [1, 1]} : vector<8x32xf32> to vector<1x32xf32>
    %cst_22 = arith.constant dense<0.000000e+00> : vector<1x32xf32>
    %28 = tpu.matmul %20, %1, %cst_22 {dimension_numbers = #tpu.dot_dimension_numbers<[1], [0], [0], [1], [0, 0, 1, 1], [], []>} : vector<1x32xf32>, vector<32x32xf32>, vector<1x32xf32> -> vector<1x32xf32>
    %29 = arith.addf %27, %28 : vector<1x32xf32>
    %cst_23 = arith.constant 0.000000e+00 : f32
    %30 = vector.broadcast %cst_23 : f32 to vector<1x32xf32>
    %31 = arith.maximumf %29, %30 : vector<1x32xf32>
    %cst_24 = arith.constant dense<0.000000e+00> : vector<1x32xf32>
    %32 = tpu.matmul %31, %5, %cst_24 {dimension_numbers = #tpu.dot_dimension_numbers<[1], [0], [0], [1], [0, 0, 1, 1], [], []>} : vector<1x32xf32>, vector<32x32xf32>, vector<1x32xf32> -> vector<1x32xf32>
    %cst_25 = arith.constant dense<0.000000e+00> : vector<1x32xf32>
    %33 = tpu.matmul %26, %3, %cst_25 {dimension_numbers = #tpu.dot_dimension_numbers<[1], [0], [0], [1], [0, 0, 1, 1], [], []>} : vector<1x32xf32>, vector<32x32xf32>, vector<1x32xf32> -> vector<1x32xf32>
    %34 = arith.addf %32, %33 : vector<1x32xf32>
    %35 = arith.addf %34, %7 : vector<1x32xf32>
    %cst_26 = arith.constant 0.000000e+00 : f32
    %36 = vector.broadcast %cst_26 : f32 to vector<1x32xf32>
    %37 = arith.maximumf %35, %36 : vector<1x32xf32>
    %38 = vector.extract_strided_slice %12 {offsets = [2, 0], sizes = [1, 32], strides = [1, 1]} : vector<8x32xf32> to vector<1x32xf32>
    %cst_27 = arith.constant dense<0.000000e+00> : vector<1x32xf32>
    %39 = tpu.matmul %31, %1, %cst_27 {dimension_numbers = #tpu.dot_dimension_numbers<[1], [0], [0], [1], [0, 0, 1, 1], [], []>} : vector<1x32xf32>, vector<32x32xf32>, vector<1x32xf32> -> vector<1x32xf32>
    %40 = arith.addf %38, %39 : vector<1x32xf32>
    %cst_28 = arith.constant 0.000000e+00 : f32
    %41 = vector.broadcast %cst_28 : f32 to vector<1x32xf32>
    %42 = arith.maximumf %40, %41 : vector<1x32xf32>
    %cst_29 = arith.constant dense<0.000000e+00> : vector<1x32xf32>
    %43 = tpu.matmul %42, %5, %cst_29 {dimension_numbers = #tpu.dot_dimension_numbers<[1], [0], [0], [1], [0, 0, 1, 1], [], []>} : vector<1x32xf32>, vector<32x32xf32>, vector<1x32xf32> -> vector<1x32xf32>
    %cst_30 = arith.constant dense<0.000000e+00> : vector<1x32xf32>
    %44 = tpu.matmul %37, %3, %cst_30 {dimension_numbers = #tpu.dot_dimension_numbers<[1], [0], [0], [1], [0, 0, 1, 1], [], []>} : vector<1x32xf32>, vector<32x32xf32>, vector<1x32xf32> -> vector<1x32xf32>
    %45 = arith.addf %43, %44 : vector<1x32xf32>
    %46 = arith.addf %45, %7 : vector<1x32xf32>
    %cst_31 = arith.constant 0.000000e+00 : f32
    %47 = vector.broadcast %cst_31 : f32 to vector<1x32xf32>
    %48 = arith.maximumf %46, %47 : vector<1x32xf32>
    %49 = vector.extract_strided_slice %12 {offsets = [3, 0], sizes = [1, 32], strides = [1, 1]} : vector<8x32xf32> to vector<1x32xf32>
    %cst_32 = arith.constant dense<0.000000e+00> : vector<1x32xf32>
    %50 = tpu.matmul %42, %1, %cst_32 {dimension_numbers = #tpu.dot_dimension_numbers<[1], [0], [0], [1], [0, 0, 1, 1], [], []>} : vector<1x32xf32>, vector<32x32xf32>, vector<1x32xf32> -> vector<1x32xf32>
    %51 = arith.addf %49, %50 : vector<1x32xf32>
    %cst_33 = arith.constant 0.000000e+00 : f32
    %52 = vector.broadcast %cst_33 : f32 to vector<1x32xf32>
    %53 = arith.maximumf %51, %52 : vector<1x32xf32>
    %cst_34 = arith.constant dense<0.000000e+00> : vector<1x32xf32>
    %54 = tpu.matmul %53, %5, %cst_34 {dimension_numbers = #tpu.dot_dimension_numbers<[1], [0], [0], [1], [0, 0, 1, 1], [], []>} : vector<1x32xf32>, vector<32x32xf32>, vector<1x32xf32> -> vector<1x32xf32>
    %cst_35 = arith.constant dense<0.000000e+00> : vector<1x32xf32>
    %55 = tpu.matmul %48, %3, %cst_35 {dimension_numbers = #tpu.dot_dimension_numbers<[1], [0], [0], [1], [0, 0, 1, 1], [], []>} : vector<1x32xf32>, vector<32x32xf32>, vector<1x32xf32> -> vector<1x32xf32>
    %56 = arith.addf %54, %55 : vector<1x32xf32>
    %57 = arith.addf %56, %7 : vector<1x32xf32>
    %cst_36 = arith.constant 0.000000e+00 : f32
    %58 = vector.broadcast %cst_36 : f32 to vector<1x32xf32>
    %59 = arith.maximumf %57, %58 : vector<1x32xf32>
    %60 = vector.extract_strided_slice %12 {offsets = [4, 0], sizes = [1, 32], strides = [1, 1]} : vector<8x32xf32> to vector<1x32xf32>
    %cst_37 = arith.constant dense<0.000000e+00> : vector<1x32xf32>
    %61 = tpu.matmul %53, %1, %cst_37 {dimension_numbers = #tpu.dot_dimension_numbers<[1], [0], [0], [1], [0, 0, 1, 1], [], []>} : vector<1x32xf32>, vector<32x32xf32>, vector<1x32xf32> -> vector<1x32xf32>
    %62 = arith.addf %60, %61 : vector<1x32xf32>
    %cst_38 = arith.constant 0.000000e+00 : f32
    %63 = vector.broadcast %cst_38 : f32 to vector<1x32xf32>
    %64 = arith.maximumf %62, %63 : vector<1x32xf32>
    %cst_39 = arith.constant dense<0.000000e+00> : vector<1x32xf32>
    %65 = tpu.matmul %64, %5, %cst_39 {dimension_numbers = #tpu.dot_dimension_numbers<[1], [0], [0], [1], [0, 0, 1, 1], [], []>} : vector<1x32xf32>, vector<32x32xf32>, vector<1x32xf32> -> vector<1x32xf32>
    %cst_40 = arith.constant dense<0.000000e+00> : vector<1x32xf32>
    %66 = tpu.matmul %59, %3, %cst_40 {dimension_numbers = #tpu.dot_dimension_numbers<[1], [0], [0], [1], [0, 0, 1, 1], [], []>} : vector<1x32xf32>, vector<32x32xf32>, vector<1x32xf32> -> vector<1x32xf32>
    %67 = arith.addf %65, %66 : vector<1x32xf32>
    %68 = arith.addf %67, %7 : vector<1x32xf32>
    %cst_41 = arith.constant 0.000000e+00 : f32
    %69 = vector.broadcast %cst_41 : f32 to vector<1x32xf32>
    %70 = arith.maximumf %68, %69 : vector<1x32xf32>
    %71 = vector.extract_strided_slice %12 {offsets = [5, 0], sizes = [1, 32], strides = [1, 1]} : vector<8x32xf32> to vector<1x32xf32>
    %cst_42 = arith.constant dense<0.000000e+00> : vector<1x32xf32>
    %72 = tpu.matmul %64, %1, %cst_42 {dimension_numbers = #tpu.dot_dimension_numbers<[1], [0], [0], [1], [0, 0, 1, 1], [], []>} : vector<1x32xf32>, vector<32x32xf32>, vector<1x32xf32> -> vector<1x32xf32>
    %73 = arith.addf %71, %72 : vector<1x32xf32>
    %cst_43 = arith.constant 0.000000e+00 : f32
    %74 = vector.broadcast %cst_43 : f32 to vector<1x32xf32>
    %75 = arith.maximumf %73, %74 : vector<1x32xf32>
    %cst_44 = arith.constant dense<0.000000e+00> : vector<1x32xf32>
    %76 = tpu.matmul %75, %5, %cst_44 {dimension_numbers = #tpu.dot_dimension_numbers<[1], [0], [0], [1], [0, 0, 1, 1], [], []>} : vector<1x32xf32>, vector<32x32xf32>, vector<1x32xf32> -> vector<1x32xf32>
    %cst_45 = arith.constant dense<0.000000e+00> : vector<1x32xf32>
    %77 = tpu.matmul %70, %3, %cst_45 {dimension_numbers = #tpu.dot_dimension_numbers<[1], [0], [0], [1], [0, 0, 1, 1], [], []>} : vector<1x32xf32>, vector<32x32xf32>, vector<1x32xf32> -> vector<1x32xf32>
    %78 = arith.addf %76, %77 : vector<1x32xf32>
    %79 = arith.addf %78, %7 : vector<1x32xf32>
    %cst_46 = arith.constant 0.000000e+00 : f32
    %80 = vector.broadcast %cst_46 : f32 to vector<1x32xf32>
    %81 = arith.maximumf %79, %80 : vector<1x32xf32>
    %82 = vector.extract_strided_slice %12 {offsets = [6, 0], sizes = [1, 32], strides = [1, 1]} : vector<8x32xf32> to vector<1x32xf32>
    %cst_47 = arith.constant dense<0.000000e+00> : vector<1x32xf32>
    %83 = tpu.matmul %75, %1, %cst_47 {dimension_numbers = #tpu.dot_dimension_numbers<[1], [0], [0], [1], [0, 0, 1, 1], [], []>} : vector<1x32xf32>, vector<32x32xf32>, vector<1x32xf32> -> vector<1x32xf32>
    %84 = arith.addf %82, %83 : vector<1x32xf32>
    %cst_48 = arith.constant 0.000000e+00 : f32
    %85 = vector.broadcast %cst_48 : f32 to vector<1x32xf32>
    %86 = arith.maximumf %84, %85 : vector<1x32xf32>
    %cst_49 = arith.constant dense<0.000000e+00> : vector<1x32xf32>
    %87 = tpu.matmul %86, %5, %cst_49 {dimension_numbers = #tpu.dot_dimension_numbers<[1], [0], [0], [1], [0, 0, 1, 1], [], []>} : vector<1x32xf32>, vector<32x32xf32>, vector<1x32xf32> -> vector<1x32xf32>
    %cst_50 = arith.constant dense<0.000000e+00> : vector<1x32xf32>
    %88 = tpu.matmul %81, %3, %cst_50 {dimension_numbers = #tpu.dot_dimension_numbers<[1], [0], [0], [1], [0, 0, 1, 1], [], []>} : vector<1x32xf32>, vector<32x32xf32>, vector<1x32xf32> -> vector<1x32xf32>
    %89 = arith.addf %87, %88 : vector<1x32xf32>
    %90 = arith.addf %89, %7 : vector<1x32xf32>
    %cst_51 = arith.constant 0.000000e+00 : f32
    %91 = vector.broadcast %cst_51 : f32 to vector<1x32xf32>
    %92 = arith.maximumf %90, %91 : vector<1x32xf32>
    %93 = vector.extract_strided_slice %12 {offsets = [7, 0], sizes = [1, 32], strides = [1, 1]} : vector<8x32xf32> to vector<1x32xf32>
    %cst_52 = arith.constant dense<0.000000e+00> : vector<1x32xf32>
    %94 = tpu.matmul %86, %1, %cst_52 {dimension_numbers = #tpu.dot_dimension_numbers<[1], [0], [0], [1], [0, 0, 1, 1], [], []>} : vector<1x32xf32>, vector<32x32xf32>, vector<1x32xf32> -> vector<1x32xf32>
    %95 = arith.addf %93, %94 : vector<1x32xf32>
    %cst_53 = arith.constant 0.000000e+00 : f32
    %96 = vector.broadcast %cst_53 : f32 to vector<1x32xf32>
    %97 = arith.maximumf %95, %96 : vector<1x32xf32>
    %cst_54 = arith.constant dense<0.000000e+00> : vector<1x32xf32>
    %98 = tpu.matmul %97, %5, %cst_54 {dimension_numbers = #tpu.dot_dimension_numbers<[1], [0], [0], [1], [0, 0, 1, 1], [], []>} : vector<1x32xf32>, vector<32x32xf32>, vector<1x32xf32> -> vector<1x32xf32>
    %cst_55 = arith.constant dense<0.000000e+00> : vector<1x32xf32>
    %99 = tpu.matmul %92, %3, %cst_55 {dimension_numbers = #tpu.dot_dimension_numbers<[1], [0], [0], [1], [0, 0, 1, 1], [], []>} : vector<1x32xf32>, vector<32x32xf32>, vector<1x32xf32> -> vector<1x32xf32>
    %100 = arith.addf %98, %99 : vector<1x32xf32>
    %101 = arith.addf %100, %7 : vector<1x32xf32>
    %cst_56 = arith.constant 0.000000e+00 : f32
    %102 = vector.broadcast %cst_56 : f32 to vector<1x32xf32>
    %103 = arith.maximumf %101, %102 : vector<1x32xf32>
    %104 = tpu.concatenate %26, %37, %48, %59, %70, %81, %92, %103 in 0 : vector<1x32xf32>, vector<1x32xf32>, vector<1x32xf32>, vector<1x32xf32>, vector<1x32xf32>, vector<1x32xf32>, vector<1x32xf32>, vector<1x32xf32> -> vector<8x32xf32>
    %c0_57 = arith.constant 0 : index
    %c0_58 = arith.constant 0 : index
    %105 = vector.load %arg6[%c0_57, %c0_58] : memref<32x8xf32, #tpu.memory_space<vmem>>, vector<32x8xf32>
    %cst_59 = arith.constant dense<0.000000e+00> : vector<8x8xf32>
    %106 = tpu.matmul %104, %105, %cst_59 {dimension_numbers = #tpu.dot_dimension_numbers<[1], [0], [0], [1], [0, 0, 1, 1], [], []>} : vector<8x32xf32>, vector<32x8xf32>, vector<8x8xf32> -> vector<8x8xf32>
    %c0_60 = arith.constant 0 : index
    %c0_61 = arith.constant 0 : index
    %107 = vector.load %arg7[%c0_60, %c0_61] : memref<1x8xf32, #tpu.memory_space<vmem>>, vector<1x8xf32>
    %108 = vector.broadcast %107 : vector<1x8xf32> to vector<8x8xf32>
    %109 = arith.addf %106, %108 : vector<8x8xf32>
    %cst_62 = arith.constant dense<0xFF800000> : vector<8xf32>
    %110 = vector.multi_reduction <maximumf>, %109, %cst_62 [1] : vector<8x8xf32> to vector<8xf32>
    %111 = vector.shape_cast %110 : vector<8xf32> to vector<8x1xf32>
    %112 = vector.broadcast %111 : vector<8x1xf32> to vector<8x8xf32>
    %113 = arith.subf %109, %112 : vector<8x8xf32>
    %114 = math.exp %113 : vector<8x8xf32>
    %cst_63 = arith.constant dense<0.000000e+00> : vector<8xf32>
    %115 = vector.multi_reduction <add>, %114, %cst_63 [1] : vector<8x8xf32> to vector<8xf32>
    %116 = vector.shape_cast %115 : vector<8xf32> to vector<8x1xf32>
    %117 = vector.broadcast %116 : vector<8x1xf32> to vector<8x8xf32>
    %118 = arith.divf %114, %117 : vector<8x8xf32>
    %c0_64 = arith.constant 0 : index
    %c0_65 = arith.constant 0 : index
    %119 = vector.load %arg8[%c0_64, %c0_65] : memref<8x8xf32, #tpu.memory_space<vmem>>, vector<8x8xf32>
    tpu.vector_store %arg8[%c0_64, %c0_65], %118 {strides = array<i32>} : memref<8x8xf32, #tpu.memory_space<vmem>>, vector<8x8xf32>,
    %120 = tpu.concatenate %97, %103 in 0 : vector<1x32xf32>, vector<1x32xf32> -> vector<2x32xf32>
    %c0_66 = arith.constant 0 : index
    %c0_67 = arith.constant 0 : index
    %121 = vector.load %arg9[%c0_66, %c0_67] : memref<2x32xf32, #tpu.memory_space<vmem>>, vector<2x32xf32>
    tpu.vector_store %arg9[%c0_66, %c0_67], %120 {strides = array<i32>} : memref<2x32xf32, #tpu.memory_space<vmem>>, vector<2x32xf32>,
    return
  }
}

</mosaic_0001>

<bundles_post_ra>
// kernel: tpu_custom_call.1
= control target key start
LH: loop header
LB: loop body
LE: loop exit
PB: predicated region body
PF: predicated region fallthrough
CT: control target
= control target key end

     0   :  { %15 = vsyncpa [#allocation3], 0  ;;  %s3220_s0 = inlined_call_operand.hbm [shape: f32[8,16], index: 0, kind: input, shape index: {}]   ;;  %s3221_s1 = inlined_call_operand.vmem [shape: f32[2,32], index: 1, kind: input, shape index: {}]   ;;  %s3222_s2 = inlined_call_operand.vmem [shape: f32[16,32], index: 2, kind: input, shape index: {}]   ;;  %s3223_s3 = inlined_call_operand.vmem [shape: f32[1,32,32], index: 3, kind: input, shape index: {}]   ;;  %s3224_s4 = inlined_call_operand.hbm [shape: f32[2,32,32], index: 4, kind: input, shape index: {}]   ;;  %s3225_s5 = inlined_call_operand.hbm [shape: f32[2,32], index: 5, kind: input, shape index: {}]   ;;  %s3226_s6 = inlined_call_operand.vmem [shape: f32[32,8], index: 6, kind: input, shape index: {}]   ;;  %s3227_s7 = inlined_call_operand.vmem [shape: f32[1,8], index: 7, kind: input, shape index: {}]   ;;  %s3228_s8 = inlined_call_operand.hbm [shape: f32[8,8], index: 8, kind: output, shape index: {0}]   ;;  %s3229_s9 = inlined_call_operand.hbm [shape: f32[2,32], index: 9, kind: output, shape index: {1}]  }
   0x1   :  { %16 = vsyncpa [#allocation6], 0 }
   0x2   :  { %17 = vsyncpa [#allocation4], 0 }
   0x3   :  { %18 = vsyncpa [#allocation10], 0  ;;  %s2844_s30 = smov [#allocation5]   ;;  %s2726_s13 = scalar_lea.hbm %s3224_s4, 1024 }
   0x4   :  { %s40_s10 = sshll.u32 %s2844_s30, 4  ;;  %p2727_p0 = scmp.ne.s32.totalorder %s3224_s4, %s2726_s13  ;;  %s41_s10 = int_to_ptr.vmem [resolvable:$true] %s40_s10 }
   0x5   :  { %p2730_p1 = scmp.lt.u32.totalorder %s2726_s13, %s3224_s4 }
   0x7   :  { %p2732_p2 = pnand %p2730_p1, %p2727_p0 }
   0x9   :  { %2735 = shalt.err (!%p2732_p2)
}
   0xa   :  { %s2736_s18 = scalar_lea.vmem %s41_s10, 1024  ;;  %p2741_p4 = scmp.lt.s32.totalorder %s41_s10, %s41_s10 }
   0xb   :  { %p2737_p3 = scmp.ne.s32.totalorder %s41_s10, %s2736_s18  ;;  %p2742_p5 = scmp.lt.s32.totalorder %s2736_s18, %s2736_s18 }
   0xd   :  { %p2743_p6 = por %p2742_p5, %p2741_p4 }
   0xf   :  { %p2744_p7 = pnand %p2743_p6, %p2737_p3 }
  0x11   :  { %2747 = shalt.err (!%p2744_p7)
}
  0x12   :  { %s2845_s19 = smov 128   ;;  %s2846_s20 = smov 8  }
  0x13   :  { %46 = dma.hbm_to_vmem [thread:$0]  %s3224_s4, 1024, %s41_s10, [#allocation6], %s2845_s19, %s2845_s19, %s2846_s20  }
  0x14   :  { %s2847_s23 = smov [#allocation2]   ;;  %s2848_s25 = smov [#allocation7]  }
  0x15   :  { %s25_s24 = sshll.u32 %s2847_s23, 4  ;;  %s53_s26 = sshll.u32 %s2848_s25, 4  ;;  %s26_s24 = int_to_ptr.vmem [resolvable:$true] %s25_s24  ;;  %s54_s26 = int_to_ptr.vmem [resolvable:$true] %s53_s26 }
  0x16   :  { %s2748_s29 = scalar_lea.hbm %s3220_s0, 128 }
  0x17   :  { %p2749_p8 = scmp.ne.s32.totalorder %s3220_s0, %s2748_s29  ;;  %p2752_p9 = scmp.lt.u32.totalorder %s2748_s29, %s3220_s0 }
  0x19   :  { %p2754_p10 = pnand %p2752_p9, %p2749_p8 }
  0x1b   :  { %2757 = shalt.err (!%p2754_p10)
}
  0x1c   :  { %s2758_s4 = scalar_lea.vmem %s26_s24, 128  ;;  %p2763_p12 = scmp.lt.s32.totalorder %s26_s24, %s26_s24 }
  0x1d   :  { %p2759_p11 = scmp.ne.s32.totalorder %s26_s24, %s2758_s4  ;;  %p2764_p13 = scmp.lt.s32.totalorder %s2758_s4, %s2758_s4 }
  0x1f   :  { %p2765_p0 = por %p2764_p13, %p2763_p12 }
  0x21   :  { %p2766_p1 = pnand %p2765_p0, %p2759_p11 }
  0x23   :  { %2769 = shalt.err (!%p2766_p1)
}
  0x24   :  { %28 = dma.hbm_to_vmem [thread:$0]  %s3220_s0, 128, %s26_s24, [#allocation3]  }
  0x25   :  { %s2770_s17 = scalar_lea.hbm %s3225_s5, 32 }
  0x26   :  { %p2771_p2 = scmp.ne.s32.totalorder %s3225_s5, %s2770_s17  ;;  %p2774_p3 = scmp.lt.u32.totalorder %s2770_s17, %s3225_s5 }
  0x28   :  { %p2776_p4 = pnand %p2774_p3, %p2771_p2 }
  0x2a   :  { %2779 = shalt.err (!%p2776_p4)
}
  0x2b   :  { %s2780_s22 = scalar_lea.vmem %s54_s26, 32  ;;  %p2785_p6 = scmp.lt.s32.totalorder %s54_s26, %s54_s26 }
  0x2c   :  { %p2781_p5 = scmp.ne.s32.totalorder %s54_s26, %s2780_s22  ;;  %p2786_p7 = scmp.lt.s32.totalorder %s2780_s22, %s2780_s22 }
  0x2e   :  { %p2787_p8 = por %p2786_p7, %p2785_p6 }
  0x30   :  { %p2788_p9 = pnand %p2787_p8, %p2781_p5 }
  0x32   :  { %2791 = shalt.err (!%p2788_p9)
}
  0x33   :  { %56 = dma.hbm_to_vmem [thread:$0]  %s3225_s5, 32, %s54_s26, [#allocation6]  }
  0x34   :  { %2836 = dma.done.wait [#allocation3], 128  }
  0x35   :  { %2837 = vsyncadd [#allocation3], 4294967168 }
  0x36   :  { %2838 = dma.done.wait [#allocation6], 1056  }
  0x37   :  { %2839 = vsyncadd [#allocation6], 4294966240  ;;  %v2849_v0 = vmov 0.0|0.0   ;;  %vm2850_vm0 = vmmov 0   ;;  %v2851_v1 = vmov 0.0   ;;  %v70_v2 = vld [vmem:[#allocation5] sm:$0xff] }
  0x38   :  { %2562 = vmatprep.subr.bf16.mxu1 %v2849_v0  ;;  %2559 = vmatprep.subr.bf16.mxu0 %v2849_v0  ;;  %v71_v3 = vld [vmem:[#allocation5 + $0x8] sm:$0xff]  ;;  %v86_v4 = vld [vmem:[%s3222_s2] sm:$0xff]  ;;  %v87_v6 = vld [vmem:[%s3222_s2 + $0x8] sm:$0xff]  ;;  %vm92_vm1 = vcmask 130048   ;;  %vm167_vm2 = vcmask 261120   ;;  %vm1974_vm3 = vcmask 1040384  }
  0x39   :  { %2281 = vmatprep.mubr.msk.f32.mxu0 %vm2850_vm0, %v2851_v1  ;;  %2292 = vmatprep.mubr.msk.f32.mxu1 %vm2850_vm0, %v2851_v1  ;;  %v2949_v5 = vpack.c.bf16 %v71_v3, %v70_v2  ;;  %v72_v7 = vld [vmem:[#allocation5 + $0x10] sm:$0xff]  ;;  %v2560_v8 = vpack.c.bf16 %v87_v6, %v86_v4  ;;  %v73_v9 = vld [vmem:[#allocation5 + $0x18] sm:$0xff]  ;;  %v75_v10 = vld [vmem:[#allocation5 + $0x20] sm:$0xff]  ;;  %vm1976_vm4 = vcmask 1041408   ;;  %vm1978_vm5 = vcmask 1042432   ;;  %s2852_s21 = smov [#allocation9]  }
  0x3a   :  { %v2955_v11 = vpack.c.bf16 %v73_v9, %v72_v7  ;;  %v76_v12 = vld [vmem:[#allocation5 + $0x28] sm:$0xff]  ;;  %v85_v13 = vld [vmem:[#allocation2] sm:$0xff]  ;;  %v77_v15 = vld [vmem:[#allocation5 + $0x30] sm:$0xff]  ;;  %vm1980_vm6 = vcmask 1043456   ;;  %vm1982_vm7 = vcmask 1044480   ;;  %vm1984_vm8 = vcmask 1045504  }
  0x3b   :  { %2564 = vmatpush3.bf16.msra.mxu1 %v2949_v5  ;;  %2561 = vmatpush3.bf16.msra.mxu0 %v2560_v8  ;;  %v2958_v14 = vpack.c.bf16 %v76_v12, %v75_v10  ;;  %v78_v16 = vld [vmem:[#allocation5 + $0x38] sm:$0xff]  ;;  %v80_v21 = vld [vmem:[%s3223_s3 + $0x8] sm:$0xff]  ;;  %v81_v23 = vld [vmem:[%s3223_s3 + $0x10] sm:$0xff]  ;;  %vm1986_vm9 = vcmask 1046528   ;;  %vm2089_vm10 = vcmask 254976   ;;  %vm2072_vm11 = vcmask 64512  }
  0x3c   :  { %2565 = vmatprep.subr.bf16.mxu1 %v2849_v0  ;;  %2568 = vmatprep.subr.bf16.mxu0 %v2849_v0  ;;  %v166_v17 = vld [vmem:[%s3221_s1] sm:$0x3]  ;;  %v2966_v18 = vpack.c.bf16 %v78_v16, %v77_v15  ;;  %v82_v24 = vld [vmem:[%s3223_s3 + $0x18] sm:$0xff]  ;;  %v2121_v26 = vld [vmem:[#allocation7] ss:$0 sm:$0xff]  ;;  %s2107_s22 = sshll.u32 %s2852_s21, 4  ;;  %s2108_s22 = int_to_ptr.vmem [resolvable:$true] %s2107_s22 }
  0x3d   :  { %v243_v19 = vrot.slane %v166_v17, 1  ;;  %v79_v20 = vld [vmem:[%s3223_s3] sm:$0xff]  ;;  %v3000_v25 = vpack.c.bf16 %v82_v24, %v81_v23  ;;  %v3021_v36 = vld [vmem:[#allocation7 + $0x1] sm:$0x1]  ;;  %s2792_s0 = scalar_lea.vmem %s2108_s22, 32  ;;  %p2797_p11 = scmp.lt.s32.totalorder %s2108_s22, %s2108_s22 }
  0x3e   :  { %2282 = vmatmul.mubr.msk.f32.vlgmr.msra.gmra.mrb[0].mxu0 %vm92_vm1, %v85_v13  ;;  %v2990_v22 = vpack.c.bf16 %v80_v21, %v79_v20  ;;  %p2793_p10 = scmp.ne.s32.totalorder %s2108_s22, %s2792_s0  ;;  %p2798_p12 = scmp.lt.s32.totalorder %s2792_s0, %s2792_s0 }
  0x3f   :  { %2567 = vmatpush3.bf16.msra.mxu1 %v2955_v11  ;;  %2570 = vmatpush3.bf16.msra.mxu0 %v2958_v14 }
  0x40   :  { %2303 = vmatprep.mubr.msk.f32.mxu0 %vm2850_vm0, %v2851_v1  ;;  %2571 = vmatprep.subr.bf16.mxu0 %v2849_v0  ;;  %p2799_p13 = por %p2798_p12, %p2797_p11 }
  0x41   :  { %2574 = vmatprep.subr.bf16.mxu1 %v2849_v0 }
  0x42   :  { %2293 = vmatmul.mubr.msk.f32.vlgmr.msra.gmra.mrb[0].mxu1 %vm167_vm2, %v166_v17  ;;  %p2800_p0 = pnand %p2799_p13, %p2793_p10 }
  0x43   :  { %2314 = vmatprep.mubr.msk.f32.mxu1 %vm2850_vm0, %v2851_v1  ;;  %2573 = vmatpush3.bf16.msra.mxu0 %v2966_v18 }
  0x44   :  { %2580 = vmatprep.subr.bf16.mxu0 %v2849_v0  ;;  %2576 = vmatpush3.bf16.msra.mxu1 %v2990_v22 }
  0x45   :  { %2577 = vmatprep.subr.bf16.mxu1 %v2849_v0 }
  0x46   :  { %2304 = vmatmul.mubr.msk.f32.vlgmr.msra.gmra.mrb[2].mxu0 %vm167_vm2, %v243_v19 }
  0x47   :  { %2582 = vmatpush3.bf16.msra.mxu0 %v2949_v5  ;;  %2325 = vmatprep.mubr.msk.f32.mxu0 %vm2850_vm0, %v2851_v1 }
  0x48   :  { %2583 = vmatprep.subr.bf16.mxu0 %v2849_v0  ;;  %2579 = vmatpush3.bf16.msra.mxu1 %v3000_v25 }
  0x49   :  { %2586 = vmatprep.subr.bf16.mxu1 %v2849_v0 }
  0x4b   :  { %2585 = vmatpush3.bf16.msra.mxu0 %v2955_v11 }
  0x4c   :  { %2592 = vmatprep.subr.bf16.mxu0 %v2849_v0 }
 0x111   :  { %v162_v27 = vpop.f32.mrb[0].mxu0 }
 0x112   :  { %v3004_v28 = vadd.f32 %v2121_v26, %v162_v27  ;;  %v2283_v29 = vpop.f32.mrb[1].mxu0 }
 0x115   :  { %v237_v30 = vpop.f32.mrb[0].mxu1 }
 0x116   :  { %v241_v31 = vadd.f32 %v237_v30, %v3004_v28  ;;  %v2294_v32 = vpop.f32.mrb[1].mxu1 }
 0x118   :  { %v242_v33 = vmax.f32 %v241_v31, 0.0 }
 0x119   :  { %v312_v34 = vpop.f32.mrb[2].mxu0 }
 0x11a   :  { %2315 = vmatmul.mubr.msk.f32.vlgmr.msra.gmra.mrb[2].mxu1 %vm167_vm2, %v242_v33  ;;  %2326 = vmatmul.mubr.msk.f32.vlgmr.msra.gmra.mrb[4].mxu0 %vm167_vm2, %v242_v33  ;;  %v2305_v35 = vpop.f32.mrb[3].mxu0 }
 0x11b   :  { %2588 = vmatpush3.bf16.msra.mxu1 %v2958_v14  ;;  %2594 = vmatpush3.bf16.msra.mxu0 %v2990_v22 }
 0x11c   :  { %2589 = vmatprep.subr.bf16.mxu1 %v2849_v0  ;;  %2595 = vmatprep.subr.bf16.mxu0 %v2849_v0 }
 0x11d   :  { %2336 = vmatprep.mubr.msk.f32.mxu1 %vm2850_vm0, %v2851_v1  ;;  %2347 = vmatprep.mubr.msk.f32.mxu0 %vm2850_vm0, %v2851_v1 }
 0x11f   :  { %2591 = vmatpush3.bf16.msra.mxu1 %v2966_v18  ;;  %2597 = vmatpush3.bf16.msra.mxu0 %v3000_v25 }
 0x120   :  { %2598 = vmatprep.subr.bf16.mxu1 %v2849_v0  ;;  %2604 = vmatprep.subr.bf16.mxu0 %v2849_v0 }
 0x1ed   :  { %v385_v37 = vpop.f32.mrb[2].mxu1  ;;  %v457_v38 = vpop.f32.mrb[4].mxu0 }
 0x1ee   :  { %v386_v39 = vadd.f32 %v385_v37, %v312_v34  ;;  %v462_v40 = vrot.slane %v457_v38, 7  ;;  %v2316_v41 = vpop.f32.mrb[3].mxu1  ;;  %v2327_v42 = vpop.f32.mrb[5].mxu0 }
 0x1f0   :  { %v3024_v43 = vadd.f32 %v386_v39, %v3021_v36  ;;  %v464_v44 = vadd.f32 %v462_v40, %v3004_v28 }
 0x1f2   :  { %v390_v45 = vmax.f32 %v3024_v43, 0.0  ;;  %v465_v46 = vmax.f32 %v464_v44, 0.0 }
 0x1f4   :  { %v540_v47 = vrot.slane %v465_v46, 1  ;;  %2337 = vmatmul.mubr.msk.f32.vlgmr.msra.gmra.mrb[4].mxu1 %vm167_vm2, %v390_v45 }
 0x1f5   :  { %2600 = vmatpush3.bf16.msra.mxu1 %v2949_v5  ;;  %2358 = vmatprep.mubr.msk.f32.mxu1 %vm2850_vm0, %v2851_v1 }
 0x1f6   :  { %2348 = vmatmul.mubr.msk.f32.vlgmr.msra.gmra.mrb[6].mxu0 %vm167_vm2, %v540_v47  ;;  %2601 = vmatprep.subr.bf16.mxu1 %v2849_v0 }
 0x1f7   :  { %2606 = vmatpush3.bf16.msra.mxu0 %v2958_v14  ;;  %2369 = vmatprep.mubr.msk.f32.mxu0 %vm2850_vm0, %v2851_v1 }
 0x1f8   :  { %2607 = vmatprep.subr.bf16.mxu0 %v2849_v0 }
 0x1f9   :  { %2603 = vmatpush3.bf16.msra.mxu1 %v2955_v11 }
 0x1fa   :  { %2610 = vmatprep.subr.bf16.mxu1 %v2849_v0 }
 0x1fb   :  { %2609 = vmatpush3.bf16.msra.mxu0 %v2966_v18 }
 0x1fc   :  { %2359 = vmatmul.mubr.msk.f32.vlgmr.msra.gmra.mrb[6].mxu1 %vm167_vm2, %v540_v47  ;;  %2616 = vmatprep.subr.bf16.mxu0 %v2849_v0 }
 0x1fd   :  { %2612 = vmatpush3.bf16.msra.mxu1 %v2990_v22  ;;  %2380 = vmatprep.mubr.msk.f32.mxu1 %vm2850_vm0, %v2851_v1 }
 0x1fe   :  { %2613 = vmatprep.subr.bf16.mxu1 %v2849_v0 }
 0x201   :  { %2615 = vmatpush3.bf16.msra.mxu1 %v3000_v25 }
 0x202   :  { %2622 = vmatprep.subr.bf16.mxu1 %v2849_v0 }
 0x2c7   :  { %v535_v48 = vpop.f32.mrb[4].mxu1 }
 0x2c8   :  { %v2338_v49 = vpop.f32.mrb[5].mxu1 }
 0x2c9   :  { %v609_v50 = vpop.f32.mrb[6].mxu0 }
 0x2ca   :  { %v610_v51 = vadd.f32 %v609_v50, %v535_v48  ;;  %v2349_v52 = vpop.f32.mrb[7].mxu0 }
 0x2cc   :  { %v613_v53 = vadd.f32 %v610_v51, %v3021_v36 }
 0x2ce   :  { %v614_v54 = vmax.f32 %v613_v53, 0.0 }
 0x2cf   :  { %v681_v55 = vpop.f32.mrb[6].mxu1 }
 0x2d0   :  { %v686_v56 = vrot.slane %v681_v55, 6  ;;  %v2360_v57 = vpop.f32.mrb[7].mxu1  ;;  %2370 = vmatmul.mubr.msk.f32.vlgmr.msra.gmra.mrb[8].mxu0 %vm167_vm2, %v614_v54  ;;  %v1959_v10 = vrot.slane %v614_v54, 7 }
 0x2d1   :  { %2618 = vmatpush3.bf16.msra.mxu0 %v2949_v5  ;;  %2391 = vmatprep.mubr.msk.f32.mxu0 %vm2850_vm0, %v2851_v1 }
 0x2d2   :  { %v688_v58 = vadd.f32 %v686_v56, %v3004_v28  ;;  %2619 = vmatprep.subr.bf16.mxu0 %v2849_v0  ;;  %v1975_v17 = vsel %vm1974_vm3, %v390_v45, %v1959_v10 }
 0x2d4   :  { %v689_v59 = vmax.f32 %v688_v58, 0.0 }
 0x2d5   :  { %2621 = vmatpush3.bf16.msra.mxu0 %v2955_v11 }
 0x2d6   :  { %v764_v60 = vrot.slane %v689_v59, 2  ;;  %2628 = vmatprep.subr.bf16.mxu0 %v2849_v0 }
 0x2d8   :  { %2381 = vmatmul.mubr.msk.f32.vlgmr.msra.gmra.mrb[8].mxu1 %vm167_vm2, %v764_v60  ;;  %2392 = vmatmul.mubr.msk.f32.vlgmr.msra.gmra.mrb[10].mxu0 %vm167_vm2, %v764_v60 }
 0x2d9   :  { %2624 = vmatpush3.bf16.msra.mxu1 %v2958_v14  ;;  %2630 = vmatpush3.bf16.msra.mxu0 %v2990_v22 }
 0x2da   :  { %2625 = vmatprep.subr.bf16.mxu1 %v2849_v0  ;;  %2631 = vmatprep.subr.bf16.mxu0 %v2849_v0 }
 0x2db   :  { %2402 = vmatprep.mubr.msk.f32.mxu1 %vm2850_vm0, %v2851_v1  ;;  %2413 = vmatprep.mubr.msk.f32.mxu0 %vm2850_vm0, %v2851_v1 }
 0x2dd   :  { %2627 = vmatpush3.bf16.msra.mxu1 %v2966_v18  ;;  %2633 = vmatpush3.bf16.msra.mxu0 %v3000_v25 }
 0x2de   :  { %2634 = vmatprep.subr.bf16.mxu1 %v2849_v0  ;;  %2640 = vmatprep.subr.bf16.mxu0 %v2849_v0 }
 0x3a3   :  { %v759_v61 = vpop.f32.mrb[8].mxu0 }
 0x3a4   :  { %v2371_v62 = vpop.f32.mrb[9].mxu0 }
 0x3ab   :  { %v833_v63 = vpop.f32.mrb[8].mxu1  ;;  %v905_v2 = vpop.f32.mrb[10].mxu0 }
 0x3ac   :  { %v834_v3 = vadd.f32 %v833_v63, %v759_v61  ;;  %v910_v4 = vrot.slane %v905_v2, 5  ;;  %v2382_v6 = vpop.f32.mrb[9].mxu1  ;;  %v2393_v7 = vpop.f32.mrb[11].mxu0 }
 0x3ae   :  { %v837_v8 = vadd.f32 %v834_v3, %v3021_v36  ;;  %v912_v9 = vadd.f32 %v910_v4, %v3004_v28 }
 0x3b0   :  { %v838_v12 = vmax.f32 %v837_v8, 0.0  ;;  %v913_v13 = vmax.f32 %v912_v9, 0.0 }
 0x3b2   :  { %v1961_v15 = vrot.slane %v838_v12, 6  ;;  %v988_v16 = vrot.slane %v913_v13, 3  ;;  %2403 = vmatmul.mubr.msk.f32.vlgmr.msra.gmra.mrb[10].mxu1 %vm167_vm2, %v838_v12 }
 0x3b3   :  { %2636 = vmatpush3.bf16.msra.mxu1 %v2949_v5  ;;  %2424 = vmatprep.mubr.msk.f32.mxu1 %vm2850_vm0, %v2851_v1 }
 0x3b4   :  { %v1977_v19 = vsel %vm1976_vm4, %v1975_v17, %v1961_v15  ;;  %2414 = vmatmul.mubr.msk.f32.vlgmr.msra.gmra.mrb[12].mxu0 %vm167_vm2, %v988_v16  ;;  %2637 = vmatprep.subr.bf16.mxu1 %v2849_v0 }
 0x3b5   :  { %2642 = vmatpush3.bf16.msra.mxu0 %v2958_v14  ;;  %2435 = vmatprep.mubr.msk.f32.mxu0 %vm2850_vm0, %v2851_v1 }
 0x3b6   :  { %2643 = vmatprep.subr.bf16.mxu0 %v2849_v0 }
 0x3b7   :  { %2639 = vmatpush3.bf16.msra.mxu1 %v2955_v11 }
 0x3b8   :  { %2646 = vmatprep.subr.bf16.mxu1 %v2849_v0 }
 0x3b9   :  { %2645 = vmatpush3.bf16.msra.mxu0 %v2966_v18 }
 0x3ba   :  { %2425 = vmatmul.mubr.msk.f32.vlgmr.msra.gmra.mrb[12].mxu1 %vm167_vm2, %v988_v16  ;;  %2652 = vmatprep.subr.bf16.mxu0 %v2849_v0 }
 0x3bb   :  { %2648 = vmatpush3.bf16.msra.mxu1 %v2990_v22  ;;  %2446 = vmatprep.mubr.msk.f32.mxu1 %vm2850_vm0, %v2851_v1 }
 0x3bc   :  { %2649 = vmatprep.subr.bf16.mxu1 %v2849_v0 }
 0x3bf   :  { %2651 = vmatpush3.bf16.msra.mxu1 %v3000_v25 }
 0x3c0   :  { %2658 = vmatprep.subr.bf16.mxu1 %v2849_v0 }
 0x485   :  { %v983_v20 = vpop.f32.mrb[10].mxu1 }
 0x486   :  { %v2404_v21 = vpop.f32.mrb[11].mxu1 }
 0x487   :  { %v1057_v23 = vpop.f32.mrb[12].mxu0 }
 0x488   :  { %v1058_v24 = vadd.f32 %v1057_v23, %v983_v20  ;;  %v2415_v26 = vpop.f32.mrb[13].mxu0  ;;  %v1988_v20 = vld [vmem:[%s3226_s6] sm:$0xff]  ;;  %v1990_v23 = vld [vmem:[%s3226_s6 + $0x10] sm:$0xff] }
 0x48a   :  { %v1061_v27 = vadd.f32 %v1058_v24, %v3021_v36 }
 0x48c   :  { %v1062_v29 = vmax.f32 %v1061_v27, 0.0 }
 0x48d   :  { %v1129_v30 = vpop.f32.mrb[12].mxu1 }
 0x48e   :  { %v1963_v31 = vrot.slane %v1062_v29, 5  ;;  %v1134_v32 = vrot.slane %v1129_v30, 4  ;;  %v2426_v33 = vpop.f32.mrb[13].mxu1  ;;  %2436 = vmatmul.mubr.msk.f32.vlgmr.msra.gmra.mrb[14].mxu0 %vm167_vm2, %v1062_v29 }
 0x48f   :  { %2654 = vmatpush3.bf16.msra.mxu0 %v2949_v5  ;;  %2457 = vmatprep.mubr.msk.f32.mxu0 %vm2850_vm0, %v2851_v1 }
 0x490   :  { %v1979_v34 = vsel %vm1978_vm5, %v1977_v19, %v1963_v31  ;;  %v1136_v35 = vadd.f32 %v1134_v32, %v3004_v28  ;;  %2655 = vmatprep.subr.bf16.mxu0 %v2849_v0 }
 0x492   :  { %v1137_v37 = vmax.f32 %v1136_v35, 0.0 }
 0x493   :  { %2657 = vmatpush3.bf16.msra.mxu0 %v2955_v11 }
 0x494   :  { %v1212_v38 = vrot.slane %v1137_v37, 4  ;;  %2664 = vmatprep.subr.bf16.mxu0 %v2849_v0 }
 0x496   :  { %2447 = vmatmul.mubr.msk.f32.vlgmr.msra.gmra.mrb[14].mxu1 %vm167_vm2, %v1212_v38  ;;  %2458 = vmatmul.mubr.msk.f32.vlgmr.msra.gmra.mrb[16].mxu0 %vm167_vm2, %v1212_v38  ;;  %v2147_v38 = vld [vmem:[%s3227_s7] ss:$0 sm:$0xff] }
 0x497   :  { %2660 = vmatpush3.bf16.msra.mxu1 %v2958_v14  ;;  %2666 = vmatpush3.bf16.msra.mxu0 %v2990_v22 }
 0x498   :  { %2661 = vmatprep.subr.bf16.mxu1 %v2849_v0  ;;  %2667 = vmatprep.subr.bf16.mxu0 %v2849_v0 }
 0x499   :  { %2468 = vmatprep.mubr.msk.f32.mxu1 %vm2850_vm0, %v2851_v1  ;;  %2479 = vmatprep.mubr.msk.f32.mxu0 %vm2850_vm0, %v2851_v1 }
 0x49b   :  { %2663 = vmatpush3.bf16.msra.mxu1 %v2966_v18  ;;  %2669 = vmatpush3.bf16.msra.mxu0 %v3000_v25 }
 0x49c   :  { %2670 = vmatprep.subr.bf16.mxu1 %v2849_v0  ;;  %2676 = vmatprep.subr.bf16.mxu0 %v2849_v0 }
 0x561   :  { %v1207_v39 = vpop.f32.mrb[14].mxu0 }
 0x562   :  { %v2437_v40 = vpop.f32.mrb[15].mxu0 }
 0x569   :  { %v1281_v41 = vpop.f32.mrb[14].mxu1  ;;  %v1353_v42 = vpop.f32.mrb[16].mxu0 }
 0x56a   :  { %v1282_v43 = vadd.f32 %v1281_v41, %v1207_v39  ;;  %v1358_v44 = vrot.slane %v1353_v42, 3  ;;  %v2448_v45 = vpop.f32.mrb[15].mxu1  ;;  %v2459_v46 = vpop.f32.mrb[17].mxu0 }
 0x56c   :  { %v1285_v47 = vadd.f32 %v1282_v43, %v3021_v36  ;;  %v1360_v48 = vadd.f32 %v1358_v44, %v3004_v28 }
 0x56e   :  { %v1286_v49 = vmax.f32 %v1285_v47, 0.0  ;;  %v1361_v50 = vmax.f32 %v1360_v48, 0.0 }
 0x570   :  { %v1965_v51 = vrot.slane %v1286_v49, 4  ;;  %v1436_v52 = vrot.slane %v1361_v50, 5  ;;  %2469 = vmatmul.mubr.msk.f32.vlgmr.msra.gmra.mrb[16].mxu1 %vm167_vm2, %v1286_v49 }
 0x571   :  { %2672 = vmatpush3.bf16.msra.mxu1 %v2949_v5  ;;  %2490 = vmatprep.mubr.msk.f32.mxu1 %vm2850_vm0, %v2851_v1 }
 0x572   :  { %v1981_v53 = vsel %vm1980_vm6, %v1979_v34, %v1965_v51  ;;  %2480 = vmatmul.mubr.msk.f32.vlgmr.msra.gmra.mrb[18].mxu0 %vm167_vm2, %v1436_v52  ;;  %2673 = vmatprep.subr.bf16.mxu1 %v2849_v0 }
 0x573   :  { %2678 = vmatpush3.bf16.msra.mxu0 %v2958_v14  ;;  %2501 = vmatprep.mubr.msk.f32.mxu0 %vm2850_vm0, %v2851_v1 }
 0x574   :  { %2679 = vmatprep.subr.bf16.mxu0 %v2849_v0 }
 0x575   :  { %2675 = vmatpush3.bf16.msra.mxu1 %v2955_v11 }
 0x576   :  { %2682 = vmatprep.subr.bf16.mxu1 %v2849_v0 }
 0x577   :  { %2681 = vmatpush3.bf16.msra.mxu0 %v2966_v18 }
 0x578   :  { %2491 = vmatmul.mubr.msk.f32.vlgmr.msra.gmra.mrb[18].mxu1 %vm167_vm2, %v1436_v52  ;;  %2688 = vmatprep.subr.bf16.mxu0 %v2849_v0 }
 0x579   :  { %2684 = vmatpush3.bf16.msra.mxu1 %v2990_v22  ;;  %2512 = vmatprep.mubr.msk.f32.mxu1 %vm2850_vm0, %v2851_v1 }
 0x57a   :  { %2685 = vmatprep.subr.bf16.mxu1 %v2849_v0 }
 0x57d   :  { %2687 = vmatpush3.bf16.msra.mxu1 %v3000_v25 }
 0x57e   :  { %2694 = vmatprep.subr.bf16.mxu1 %v2849_v0 }
 0x643   :  { %v1431_v54 = vpop.f32.mrb[16].mxu1 }
 0x644   :  { %v2470_v55 = vpop.f32.mrb[17].mxu1 }
 0x645   :  { %v1505_v56 = vpop.f32.mrb[18].mxu0 }
 0x646   :  { %v1506_v57 = vadd.f32 %v1505_v56, %v1431_v54  ;;  %v2481_v58 = vpop.f32.mrb[19].mxu0 }
 0x648   :  { %v1509_v59 = vadd.f32 %v1506_v57, %v3021_v36 }
 0x64a   :  { %v1510_v60 = vmax.f32 %v1509_v59, 0.0 }
 0x64b   :  { %v1577_v61 = vpop.f32.mrb[18].mxu1 }
 0x64c   :  { %v1967_v62 = vrot.slane %v1510_v60, 3  ;;  %v1582_v63 = vrot.slane %v1577_v61, 2  ;;  %v2492_v2 = vpop.f32.mrb[19].mxu1  ;;  %2502 = vmatmul.mubr.msk.f32.vlgmr.msra.gmra.mrb[20].mxu0 %vm167_vm2, %v1510_v60 }
 0x64d   :  { %2690 = vmatpush3.bf16.msra.mxu0 %v2949_v5  ;;  %2523 = vmatprep.mubr.msk.f32.mxu0 %vm2850_vm0, %v2851_v1 }
 0x64e   :  { %v1983_v3 = vsel %vm1982_vm7, %v1981_v53, %v1967_v62  ;;  %v1584_v4 = vadd.f32 %v1582_v63, %v3004_v28  ;;  %2691 = vmatprep.subr.bf16.mxu0 %v2849_v0 }
 0x650   :  { %v1585_v6 = vmax.f32 %v1584_v4, 0.0 }
 0x651   :  { %2693 = vmatpush3.bf16.msra.mxu0 %v2955_v11 }
 0x652   :  { %v1660_v7 = vrot.slane %v1585_v6, 6  ;;  %2700 = vmatprep.subr.bf16.mxu0 %v2849_v0 }
 0x654   :  { %2513 = vmatmul.mubr.msk.f32.vlgmr.msra.gmra.mrb[20].mxu1 %vm167_vm2, %v1660_v7  ;;  %2524 = vmatmul.mubr.msk.f32.vlgmr.msra.gmra.mrb[22].mxu0 %vm167_vm2, %v1660_v7 }
 0x655   :  { %2696 = vmatpush3.bf16.msra.mxu1 %v2958_v14  ;;  %2702 = vmatpush3.bf16.msra.mxu0 %v2990_v22 }
 0x656   :  { %2697 = vmatprep.subr.bf16.mxu1 %v2849_v0  ;;  %2703 = vmatprep.subr.bf16.mxu0 %v2849_v0 }
 0x657   :  { %2534 = vmatprep.mubr.msk.f32.mxu1 %vm2850_vm0, %v2851_v1  ;;  %2545 = vmatprep.mubr.msk.f32.mxu0 %vm2850_vm0, %v2851_v1 }
 0x659   :  { %2699 = vmatpush3.bf16.msra.mxu1 %v2966_v18  ;;  %2705 = vmatpush3.bf16.msra.mxu0 %v3000_v25 }
 0x65a   :  { %2706 = vmatprep.subr.bf16.mxu1 %v2849_v0 }
 0x71f   :  { %v1655_v5 = vpop.f32.mrb[20].mxu0 }
 0x720   :  { %v2503_v11 = vpop.f32.mrb[21].mxu0 }
 0x727   :  { %v1729_v14 = vpop.f32.mrb[20].mxu1  ;;  %v1801_v22 = vpop.f32.mrb[22].mxu0 }
 0x728   :  { %v1730_v8 = vadd.f32 %v1729_v14, %v1655_v5  ;;  %v1806_v9 = vrot.slane %v1801_v22, 1  ;;  %v2514_v10 = vpop.f32.mrb[21].mxu1  ;;  %v2525_v12 = vpop.f32.mrb[23].mxu0 }
 0x72a   :  { %v1733_v13 = vadd.f32 %v1730_v8, %v3021_v36  ;;  %v1808_v15 = vadd.f32 %v1806_v9, %v3004_v28  ;;  %v1989_v28 = vld [vmem:[%s3226_s6 + $0x8] sm:$0xff] }
 0x72b   :  { %v2707_v21 = vpack.c.bf16 %v1989_v28, %v1988_v20 }
 0x72c   :  { %v1734_v16 = vmax.f32 %v1733_v13, 0.0  ;;  %v1809_v17 = vmax.f32 %v1808_v15, 0.0 }
 0x72e   :  { %v1969_v18 = vrot.slane %v1734_v16, 2  ;;  %v1884_v19 = vrot.slane %v1809_v17, 7  ;;  %2535 = vmatmul.mubr.msk.f32.vlgmr.msra.gmra.mrb[22].mxu1 %vm167_vm2, %v1734_v16 }
 0x72f   :  { %2556 = vmatprep.mubr.msk.f32.mxu1 %vm2850_vm0, %v2851_v1  ;;  %2708 = vmatpush3.bf16.msra.mxu1 %v2707_v21  ;;  %v1991_v1 = vld [vmem:[%s3226_s6 + $0x18] sm:$0xff] }
 0x730   :  { %2546 = vmatmul.mubr.msk.f32.vlgmr.msra.gmra.mrb[24].mxu0 %vm167_vm2, %v1884_v19  ;;  %v1985_v25 = vsel %vm1984_vm8, %v1983_v3, %v1969_v18  ;;  %2709 = vmatprep.subr.bf16.mxu1 %v2849_v0  ;;  %v2710_v24 = vpack.c.bf16 %v1991_v1, %v1990_v23 }
 0x733   :  { %2711 = vmatpush3.bf16.msra.mxu1 %v2710_v24 }
 0x801   :  { %v1879_v26 = vpop.f32.mrb[22].mxu1 }
 0x802   :  { %v2536_v27 = vpop.f32.mrb[23].mxu1 }
 0x803   :  { %v1953_v29 = vpop.f32.mrb[24].mxu0 }
 0x804   :  { %v1954_v30 = vadd.f32 %v1953_v29, %v1879_v26  ;;  %v2547_v31 = vpop.f32.mrb[25].mxu0 }
 0x806   :  { %v1957_v32 = vadd.f32 %v1954_v30, %v3021_v36 }
 0x808   :  { %v1958_v33 = vmax.f32 %v1957_v32, 0.0 }
 0x80a   :  { %v1972_v0 = vrot.slane %v1958_v33, 1  ;;  %v2086_v34 = vrot.slane %v1958_v33, 7 }
 0x80c   :  { %v1987_v35 = vsel %vm1986_vm9, %v1985_v25, %v1972_v0  ;;  %v2088_v37 = vsel %vm1974_vm3, %v1884_v19, %v2086_v34 }
 0x80d   :  { %2557 = vmatmul.mubr.msk.f32.vlgmr.msra.gmra.mrb[24].mxu1 %vm167_vm2, %v1987_v35  ;;  %2090 = vst.msk [vmem:[#allocation9] sm:$0x3] %vm2089_vm10, %v2088_v37 }
 0x8e0   :  { %v2068_v39 = vpop.f32.mrb[24].mxu1 }
 0x8e1   :  { %v2069_v40 = vadd.f32 %v2147_v38, %v2068_v39  ;;  %v2558_v41 = vpop.f32.mrb[25].mxu1 }
 0x8e3   :  { %v2073_v36 = vsel %vm2072_vm11, %v2069_v40, -inf }
 0x8e4   :  { %2074 = vmax.xlane.f32.xlu0 %v2073_v36 }
 0x971   :  { %v2075_v42 = vpop.xlane.xlu0 %2074 }
 0x972   :  { %v2076_v43 = vsub.f32 %v2069_v40, %v2075_v42 }
 0x974   :  { %v2077_v44 = vmul.f32 1.442695, %v2076_v43 }
 0x976   :  { %2722 = vpow2.f32 %v2077_v44 }
 0x980   :  { %v2723_v45 = vpop.eup %2722 }
 0x981   :  { %v2079_v46 = vsel %vm2072_vm11, %v2723_v45, 0.0 }
 0x982   :  { %2080 = vadd.xlane.f32.xlu0 %v2079_v46 }
 0x983   :  { %2803 = shalt.err (!%p2800_p0)
}
 0x984   :  { %s2804_s5 = scalar_lea.hbm %s3229_s9, 32 }
 0x985   :  { %p2805_p1 = scmp.ne.s32.totalorder %s3229_s9, %s2804_s5  ;;  %p2808_p2 = scmp.lt.u32.totalorder %s2804_s5, %s3229_s9 }
 0x987   :  { %p2810_p3 = pnand %p2808_p2, %p2805_p1 }
 0x989   :  { %2813 = shalt.err (!%p2810_p3)
}
 0x98a   :  { %2110 = dma.vmem_to_hbm [thread:$0]  %s2108_s22, 32, %s3229_s9, [#allocation10]  }
 0x98b   :  { %s2853_s28 = smov [#allocation8]  }
 0x98c   :  { %s2097_s29 = sshll.u32 %s2853_s28, 4  ;;  %s2098_s29 = int_to_ptr.vmem [resolvable:$true] %s2097_s29 }
 0x98d   :  { %s2814_s30 = scalar_lea.vmem %s2098_s29, 128  ;;  %p2819_p5 = scmp.lt.s32.totalorder %s2098_s29, %s2098_s29 }
 0x98e   :  { %p2815_p4 = scmp.ne.s32.totalorder %s2098_s29, %s2814_s30  ;;  %p2820_p6 = scmp.lt.s32.totalorder %s2814_s30, %s2814_s30 }
 0x990   :  { %p2821_p7 = por %p2820_p6, %p2819_p5 }
 0x992   :  { %p2822_p8 = pnand %p2821_p7, %p2815_p4 }
 0xa0f   :  { %v2081_v47 = vpop.xlane.xlu0 %2080 }
 0xa10   :  { %2724 = vrcp.f32 %v2081_v47 }
 0xa1a   :  { %v2725_v48 = vpop.eup %2724 }
 0xa1b   :  { %v2083_v49 = vmul.f32 %v2725_v48, %v2723_v45 }
 0xa1d   :  { %2084 = vst.msk [vmem:[#allocation8] sm:$0xff] %vm2072_vm11, %v2083_v49 }
 0xa1e   :  { %2825 = shalt.err (!%p2822_p8)
}
 0xa1f   :  { %s2826_s9 = scalar_lea.hbm %s3228_s8, 128 }
 0xa20   :  { %p2827_p9 = scmp.ne.s32.totalorder %s3228_s8, %s2826_s9  ;;  %p2830_p10 = scmp.lt.u32.totalorder %s2826_s9, %s3228_s8 }
 0xa22   :  { %p2832_p11 = pnand %p2830_p10, %p2827_p9 }
 0xa24   :  { %2835 = shalt.err (!%p2832_p11)
}
 0xa25   :  { %2100 = dma.vmem_to_hbm [thread:$0]  %s2098_s29, 128, %s3228_s8, [#allocation4]  }
 0xa26   :  { %2840 = dma.done.wait [#allocation4], 128  }
 0xa27   :  { %2841 = vsyncadd [#allocation4], 4294967168 }
 0xa28   :  { %2842 = dma.done.wait [#allocation10], 32  }
 0xa29   :  { %2843 = vsyncadd [#allocation10], 4294967264 }
 0xa2a   :  { %2117 = vsyncpa [#allocation3], 1 }
 0xa2b   :  { %2118 = vsyncpa [#allocation6], 1 }
 0xa2c   :  { %2119 = vsyncpa [#allocation4], 1 }
 0xa2d   :  { %2120 = vsyncpa [#allocation10], 1 }

</bundles_post_ra>
